<compile_context>
chip_gen: v7x
topology: tpu7x:2x2x1
jax: 0.10.0
libtpu: 0.0.40
codegen_flags: <defaults>
</compile_context>

<pallas_src>
import jax
import jax.numpy as jnp
from jax.experimental import pallas as pl
from jax.experimental.pallas import tpu as pltpu

_LANE = 128


def _round_up(n, m):
    return ((n + m - 1) // m) * m


def _make_kernel(hidden_dim: int, block_k: int, needs_k_mask: bool):
    def kernel(x_ref, w_ref, b_ref, o_ref, acc_ref):
        # x_ref: (tm, tk) VMEM; w_ref: (1, tk) VMEM (lane-dense weight);
        # b_ref: (1,) SMEM; o_ref: (tm, 1) VMEM; acc_ref: (tm, 1) f32 scratch.
        k = pl.program_id(1)

        @pl.when(k == 0)
        def _():
            acc_ref[...] = jnp.zeros_like(acc_ref)

        x = x_ref[...]
        w = w_ref[...]
        if x.dtype != jnp.float32:
            x = x.astype(jnp.float32)
        if w.dtype != jnp.float32:
            w = w.astype(jnp.float32)
        prod = x * w                                   # (tm, tk) VPU multiply
        if needs_k_mask:
            # Ragged tail K block: zero the out-of-bounds (stale) columns.
            col = k * block_k + jax.lax.broadcasted_iota(
                jnp.int32, (1, block_k), 1)
            prod = jnp.where(col < hidden_dim, prod, 0.0)
        acc_ref[...] += jnp.sum(prod, axis=-1, keepdims=True)

        @pl.when(k == pl.num_programs(1) - 1)
        def _():
            o_ref[...] = (acc_ref[...] + b_ref[0]).astype(o_ref.dtype)

    return kernel


def stop_linear(x, weight, bias, *, block_m=None, block_k=None,
                row_budget_bytes=32 * 1024 * 1024):
    """StopLinear forward: x @ weight.T + bias.

    x: [..., H]; weight: [1, H] (torch nn.Linear layout); bias: [1].
    Returns [..., 1] in x.dtype.
    """
    *lead, H = x.shape
    M = 1
    for d in lead:
        M *= d
    x2d = x.reshape(M, H)
    w_row = weight.reshape(1, H)            # lane-dense weight row
    b = bias.reshape(1)

    itemsize = jnp.dtype(x.dtype).itemsize
    out_itemsize = itemsize
    sub = max(8, 8 * (4 // itemsize))       # sublane packing: 8 f32 / 16 bf16 / 32 int8

    # --- K (hidden) tile -----------------------------------------------------
    h_phys = _round_up(H, _LANE)            # physical lane footprint of a full row
    if block_k is not None:
        tk = min(block_k, H)
        if tk < H:                          # partial K blocks must be lane-aligned
            tk = max(_LANE, (tk // _LANE) * _LANE)
    else:
        # Split K only when even a minimal (sub-row) full-H tile blows the budget.
        if sub * h_phys * itemsize <= row_budget_bytes // 2:
            tk = H
        else:
            tk = max(_LANE,
                     ((row_budget_bytes // 2) // (sub * itemsize)) // _LANE * _LANE)
    tk_phys = h_phys if tk == H else tk
    nk = pl.cdiv(H, tk)
    needs_k_mask = (H % tk) != 0

    # --- M (row) tile: budget the double-buffered x tiles plus the lane-padded
    # (tm, 1) output blocks and the f32 accumulator scratch --------------------
    per_row = (2 * tk_phys * itemsize            # x, double-buffered
               + 2 * _LANE * out_itemsize        # (tm, 1) out, lane-padded, x2 buffers
               + _LANE * 4)                      # f32 accumulator
    tm = max(sub, (row_budget_bytes // per_row) // sub * sub)
    if block_m is not None:
        tm = max(sub, (min(tm, block_m) // sub) * sub)
    if tm >= M:
        tm = M                                   # single full-extent row block
    grid = (pl.cdiv(M, tm), nk)

    # --- VMEM limit derived from the actual allocation (v7x: 64 MiB per TC;
    # default budget keeps this comfortably below ~48 MiB) --------------------
    est = (2 * _round_up(tm, 8) * max(tk_phys, _LANE) * itemsize   # x buffers
           + 2 * 8 * max(tk_phys, _LANE) * itemsize                # weight buffers
           + 2 * _round_up(tm, 8) * _LANE * out_itemsize           # out buffers
           + _round_up(tm, 8) * _LANE * 4)                         # acc scratch
    vmem_limit = int(max(est + (8 << 20), 32 << 20))

    kernel = _make_kernel(H, tk, needs_k_mask)

    out = pl.pallas_call(
        kernel,
        out_shape=jax.ShapeDtypeStruct((M, 1), x.dtype),
        grid_spec=pltpu.PrefetchScalarGridSpec(
            num_scalar_prefetch=0,
            grid=grid,
            in_specs=[
                pl.BlockSpec((tm, tk), lambda i, k: (i, k)),        # x tile (pipelined)
                pl.BlockSpec((1, tk), lambda i, k: (0, k)),         # lane-dense weight
                pl.BlockSpec(memory_space=pltpu.MemorySpace.SMEM),  # bias scalar
            ],
            out_specs=pl.BlockSpec((tm, 1), lambda i, k: (i, 0)),
            scratch_shapes=[pltpu.VMEM((tm, 1), jnp.float32)],
        ),
        compiler_params=pltpu.CompilerParams(
            # M axis "parallel" -> shardable across v7x's two TensorCores;
            # K axis carries the accumulator -> "arbitrary", placed last.
            dimension_semantics=("parallel", "arbitrary"),
            vmem_limit_bytes=vmem_limit,
        ),
        cost_estimate=pl.CostEstimate(
            flops=2 * M * H,
            bytes_accessed=M * H * itemsize + H * itemsize
            + M * out_itemsize + itemsize,
            transcendentals=0,
        ),
    )(x2d, w_row, b)

    return out.reshape(*lead, 1)


if __name__ == "__main__":
    key = jax.random.PRNGKey(0)
    batch, seq, hidden = 2, 8, 32
    kx, kw, kb, kx2, kw2, kb2 = jax.random.split(key, 6)

    x = jax.random.normal(kx, (batch, seq, hidden), dtype=jnp.float32)
    bound = 1.0 / (hidden ** 0.5)
    weight = jax.random.uniform(kw, (1, hidden), minval=-bound, maxval=bound,
                                dtype=jnp.float32)
    bias = jax.random.uniform(kb, (1,), minval=-bound, maxval=bound,
                              dtype=jnp.float32)
    y_ref = x @ weight.T + bias

    # 1) Default path: one full-extent row block, single K block.
    y = stop_linear(x, weight, bias)
    jax.block_until_ready(y)
    assert y.shape == (batch, seq, 1), y.shape
    assert jnp.allclose(y, y_ref, atol=1e-5, rtol=1e-5)

    # 2) Tiled-M pipeline on the same data (block_m=8 -> grid=(2, 1)).
    y_tiled = stop_linear(x, weight, bias, block_m=8)
    jax.block_until_ready(y_tiled)
    assert jnp.allclose(y_tiled, y_ref, atol=1e-5, rtol=1e-5)

    # 3) Ragged last M block, no wrapper padding (M=18, block_m=8 -> grid=(3, 1)).
    x3 = jax.random.normal(kx2, (batch, 9, hidden), dtype=jnp.float32)
    y3 = stop_linear(x3, weight, bias, block_m=8)
    jax.block_until_ready(y3)
    assert y3.shape == (batch, 9, 1), y3.shape
    assert jnp.allclose(y3, x3 @ weight.T + bias, atol=1e-5, rtol=1e-5)

    # 4) K-split with a ragged, in-kernel-masked tail block (H=200, block_k=128).
    hidden2 = 200
    x4 = jax.random.normal(kx2, (batch, seq, hidden2), dtype=jnp.float32)
    bound2 = 1.0 / (hidden2 ** 0.5)
    w4 = jax.random.uniform(kw2, (1, hidden2), minval=-bound2, maxval=bound2,
                            dtype=jnp.float32)
    b4 = jax.random.uniform(kb2, (1,), minval=-bound2, maxval=bound2,
                            dtype=jnp.float32)
    y4 = stop_linear(x4, w4, b4, block_k=128)
    jax.block_until_ready(y4)
    assert jnp.allclose(y4, x4 @ w4.T + b4, atol=1e-5, rtol=1e-5)

    print("KERNEL_OK")
</pallas_src>

<mosaic_0001>
module attributes {stable_mosaic.version = 11 : i64} {
  func.func @kernel(%arg0: i32, %arg1: i32, %arg2: memref<16x32xf32, #tpu.memory_space<vmem>>, %arg3: memref<1x32xf32, #tpu.memory_space<vmem>>, %arg4: memref<1xf32, #tpu.memory_space<smem>>, %arg5: memref<16x1xf32, #tpu.memory_space<vmem>>, %arg6: memref<16x1xf32, #tpu.memory_space<vmem>>) attributes {dimension_semantics = [#tpu.dimension_semantics<parallel>, #tpu.dimension_semantics<arbitrary>], iteration_bounds = array<i64: 1, 1>, scalar_prefetch = 0 : i64, scratch_operands = 1 : i64, tpu.core_type = #tpu.core_type<tc>, window_params = [{transform_indices = @transform_0, window_bounds = array<i64: 16, 32>}, {transform_indices = @transform_1, window_bounds = array<i64: 1, 32>}, {transform_indices = @transform_2, window_bounds = array<i64: 1>}, {transform_indices = @transform_3, window_bounds = array<i64: 16, 1>}]} {
    %c0_i32 = arith.constant 0 : i32
    %0 = arith.cmpi eq, %arg1, %c0_i32 : i32
    %1 = arith.extui %0 : i1 to i32
    %c0_i32_0 = arith.constant 0 : i32
    %2 = arith.cmpi ne, %1, %c0_i32_0 : i32
    scf.if %2 {
      %cst_10 = arith.constant 0.000000e+00 : f32
      %15 = vector.broadcast %cst_10 : f32 to vector<16x1xf32>
      %c0_11 = arith.constant 0 : index
      %c0_12 = arith.constant 0 : index
      %16 = vector.load %arg6[%c0_11, %c0_12] : memref<16x1xf32, #tpu.memory_space<vmem>>, vector<16x1xf32>
      tpu.vector_store %arg6[%c0_11, %c0_12], %15 {strides = array<i32>} : memref<16x1xf32, #tpu.memory_space<vmem>>, vector<16x1xf32>,
    } else {
    }
    %c0 = arith.constant 0 : index
    %c0_1 = arith.constant 0 : index
    %3 = vector.load %arg2[%c0, %c0_1] : memref<16x32xf32, #tpu.memory_space<vmem>>, vector<16x32xf32>
    %c0_2 = arith.constant 0 : index
    %c0_3 = arith.constant 0 : index
    %4 = vector.load %arg3[%c0_2, %c0_3] : memref<1x32xf32, #tpu.memory_space<vmem>>, vector<1x32xf32>
    %5 = vector.broadcast %4 : vector<1x32xf32> to vector<16x32xf32>
    %6 = arith.mulf %3, %5 : vector<16x32xf32>
    %c0_4 = arith.constant 0 : index
    %c0_5 = arith.constant 0 : index
    %7 = vector.load %arg6[%c0_4, %c0_5] : memref<16x1xf32, #tpu.memory_space<vmem>>, vector<16x1xf32>
    %cst = arith.constant dense<0.000000e+00> : vector<16xf32>
    %8 = vector.multi_reduction <add>, %6, %cst [1] : vector<16x32xf32> to vector<16xf32>
    %9 = vector.shape_cast %8 : vector<16xf32> to vector<16x1xf32>
    %10 = arith.addf %7, %9 : vector<16x1xf32>
    %c0_6 = arith.constant 0 : index
    %c0_7 = arith.constant 0 : index
    %11 = vector.load %arg6[%c0_6, %c0_7] : memref<16x1xf32, #tpu.memory_space<vmem>>, vector<16x1xf32>
    tpu.vector_store %arg6[%c0_6, %c0_7], %10 {strides = array<i32>} : memref<16x1xf32, #tpu.memory_space<vmem>>, vector<16x1xf32>,
    %c0_i32_8 = arith.constant 0 : i32
    %12 = arith.cmpi eq, %arg1, %c0_i32_8 : i32
    %13 = arith.extui %12 : i1 to i32
    %c0_i32_9 = arith.constant 0 : i32
    %14 = arith.cmpi ne, %13, %c0_i32_9 : i32
    scf.if %14 {
      %c0_10 = arith.constant 0 : index
      %c0_11 = arith.constant 0 : index
      %15 = vector.load %arg6[%c0_10, %c0_11] : memref<16x1xf32, #tpu.memory_space<vmem>>, vector<16x1xf32>
      %c0_12 = arith.constant 0 : index
      %16 = memref.load %arg4[%c0_12] : memref<1xf32, #tpu.memory_space<smem>>
      %17 = vector.broadcast %16 : f32 to vector<16x1xf32>
      %18 = arith.addf %15, %17 : vector<16x1xf32>
      %c0_13 = arith.constant 0 : index
      %c0_14 = arith.constant 0 : index
      %19 = vector.load %arg5[%c0_13, %c0_14] : memref<16x1xf32, #tpu.memory_space<vmem>>, vector<16x1xf32>
      tpu.vector_store %arg5[%c0_13, %c0_14], %18 {strides = array<i32>} : memref<16x1xf32, #tpu.memory_space<vmem>>, vector<16x1xf32>,
    } else {
    }
    return
  }
  func.func @transform_0(%arg0: i32, %arg1: i32) -> (i32, i32) {
    %c0_i32 = arith.constant 0 : i32
    return %arg0, %arg1 : i32, i32
  }
  func.func @transform_1(%arg0: i32, %arg1: i32) -> (i32, i32) {
    %c0_i32 = arith.constant 0 : i32
    %c0_i32_0 = arith.constant 0 : i32
    return %c0_i32, %arg1 : i32, i32
  }
  func.func @transform_2(%arg0: i32, %arg1: i32) -> i32 {
    %c0_i32 = arith.constant 0 : i32
    %c0_i32_0 = arith.constant 0 : i32
    return %c0_i32 : i32
  }
  func.func @transform_3(%arg0: i32, %arg1: i32) -> (i32, i32) {
    %c0_i32 = arith.constant 0 : i32
    %c0_i32_0 = arith.constant 0 : i32
    return %arg0, %c0_i32 : i32, i32
  }
}

</mosaic_0001>

<bundles_post_ra>
// kernel: tpu_custom_call.1
= control target key start
LH: loop header
LB: loop body
LE: loop exit
PB: predicated region body
PF: predicated region fallthrough
CT: control target
= control target key end

     0   :  { %9 = vsyncpa [#allocation5], 0  ;;  %s106_s12 = smov [#allocation4]   ;;  %s160_s0 = inlined_call_operand.hbm [shape: f32[16,32], index: 0, kind: input, shape index: {}]   ;;  %s161_s1 = inlined_call_operand.vmem [shape: f32[1,32], index: 1, kind: input, shape index: {}]   ;;  %s162_s2 = inlined_call_operand.<no memory space> [shape: f32[1], index: 2, kind: input, shape index: {}]   ;;  %s163_s3 = inlined_call_operand.vmem [shape: f32[16,1], index: 3, kind: output, shape index: {}]  }
   0x1   :  { %s15_s13 = sshll.u32 %s106_s12, 4  ;;  %s82_s16 = scalar_lea.hbm %s160_s0, 256  ;;  %s16_s13 = int_to_ptr.vmem [resolvable:$true] %s15_s13 }
   0x2   :  { %p83_p0 = scmp.ne.s32.totalorder %s160_s0, %s82_s16  ;;  %p86_p1 = scmp.lt.u32.totalorder %s82_s16, %s160_s0 }
   0x4   :  { %p88_p2 = pnand %p86_p1, %p83_p0 }
   0x6   :  { %91 = shalt.err (!%p88_p2)
}
   0x7   :  { %s92_s21 = scalar_lea.vmem %s16_s13, 256  ;;  %p97_p4 = scmp.lt.s32.totalorder %s16_s13, %s16_s13 }
   0x8   :  { %p93_p3 = scmp.ne.s32.totalorder %s16_s13, %s92_s21  ;;  %p98_p5 = scmp.lt.s32.totalorder %s92_s21, %s92_s21 }
   0xa   :  { %p99_p6 = por %p98_p5, %p97_p4 }
   0xc   :  { %p100_p7 = pnand %p99_p6, %p93_p3 }
   0xe   :  { %103 = shalt.err (!%p100_p7)
}
   0xf   :  { %s107_s22 = smov 128   ;;  %s108_s23 = smov 8  }
  0x10   :  { %21 = dma.hbm_to_vmem [thread:$0]  %s160_s0, 256, %s16_s13, [#allocation5], %s107_s22, %s107_s22, %s108_s23  }
  0x11   :  { %104 = dma.done.wait [#allocation5], 256  }
  0x12   :  { %105 = vsyncadd [#allocation5], 4294967040  ;;  %vm33_vm0 = vcmask 7168   ;;  %v109_v0 = vmov 0.0   ;;  %v36_v1 = vld [vmem:[#allocation4] sm:$0xff]  ;;  %vm49_vm1 = vcmask 261120   ;;  %v67_v14 = vstv %s162_s2 }
  0x13   :  { %34 = vst.msk [vmem:[#allocation2] sm:$0xff] %vm33_vm0, %v109_v0  ;;  %35 = vst.msk [vmem:[#allocation2 + $0x8] sm:$0xff] %vm33_vm0, %v109_v0  ;;  %v77_v2 = vld [vmem:[%s161_s1] ss:$0 sm:$0xff]  ;;  %v37_v3 = vld [vmem:[#allocation4 + $0x8] sm:$0xff] }
  0x14   :  { %v45_v4 = vmul.f32 %v77_v2, %v36_v1  ;;  %v46_v5 = vmul.f32 %v77_v2, %v37_v3 }
  0x16   :  { %v50_v6 = vsel %vm49_vm1, %v45_v4, 0.0  ;;  %v53_v7 = vsel %vm49_vm1, %v46_v5, 0.0 }
  0x17   :  { %51 = vadd.xlane.f32.xlu0 %v50_v6 }
  0x1a   :  { %v47_v8 = vld [vmem:[#allocation2] sm:$0xff]  ;;  %v48_v11 = vld [vmem:[#allocation2 + $0x8] sm:$0xff] }
  0x1b   :  { %54 = vadd.xlane.f32.xlu0 %v53_v7 }
  0xa4   :  { %v52_v9 = vpop.xlane.xlu0 %51 }
  0xa5   :  { %v56_v10 = vadd.f32 %v52_v9, %v47_v8 }
  0xa7   :  { %59 = vst.msk [vmem:[#allocation2] sm:$0xff] %vm33_vm0, %v56_v10 }
  0xa8   :  { %v55_v12 = vpop.xlane.xlu0 %54 }
  0xa9   :  { %v57_v13 = vadd.f32 %v55_v12, %v48_v11 }
  0xab   :  { %60 = vst.msk [vmem:[#allocation2 + $0x8] sm:$0xff] %vm33_vm0, %v57_v13 }
  0xae   :  { %v64_v15 = vld [vmem:[#allocation2] sm:$0xff] }
  0xaf   :  { %v68_v16 = vadd.f32 %v67_v14, %v64_v15 }
  0xb1   :  { %70 = vst.msk [vmem:[%s163_s3] sm:$0xff] %vm33_vm0, %v68_v16 }
  0xb2   :  { %v65_v17 = vld [vmem:[#allocation2 + $0x8] sm:$0xff] }
  0xb3   :  { %v69_v18 = vadd.f32 %v67_v14, %v65_v17 }
  0xb5   :  { %71 = vst.msk [vmem:[%s163_s3 + $0x8] sm:$0xff] %vm33_vm0, %v69_v18 }
  0xb6   :  { %76 = vsyncpa [#allocation5], 1 }

</bundles_post_ra>
